<compile_context>
chip_gen: v5e
topology: v5e:2x2
jax: 0.10.0
libtpu: 0.0.40
codegen_flags: <defaults>
</compile_context>

<pallas_src>
import functools

import jax
import jax.numpy as jnp
from jax.experimental import pallas as pl
from jax.experimental.pallas import tpu as pltpu

EPS = 1e-5
NEG_SLOPE = 0.2
MB = 1024 * 1024


def _tpu_config():
    """Per-generation VMEM / tile budgets (v7x: 64 MiB VMEM, others: 128 MiB)."""
    try:
        kind = jax.devices()[0].device_kind.lower()
    except Exception:
        kind = ""
    if "v7" in kind:
        return dict(vmem_limit=48 * MB, stats_tile=8 * MB, norm_tile=5 * MB,
                    single_pass_max=10 * MB, stats_buffers=3)
    # v5e / v6e / other 128-MiB-VMEM parts (and unknown fallback).
    return dict(vmem_limit=96 * MB, stats_tile=16 * MB, norm_tile=12 * MB,
                single_pass_max=24 * MB, stats_buffers=2)


# ----------------------------- kernels ------------------------------------


def _fused_kernel(x_ref, gamma_ref, beta_ref, o_ref, *, eps, slope):
    """Whole (N, C, HW) slab resident in VMEM: stats + normalize, one pass."""
    n, c, hw = x_ref.shape
    count = float(n * hw)
    zeros = jnp.zeros((c, 1), jnp.float32)

    def stats_body(i, carry):
        s, ss = carry
        xf = x_ref[i].astype(jnp.float32)                   # (C, HW)
        s = s + jnp.sum(xf, axis=1, keepdims=True)
        ss = ss + jnp.sum(xf * xf, axis=1, keepdims=True)
        return s, ss

    # fori_loop (not an unrolled Python loop) bounds the live range of the
    # (C, HW) f32 temporaries -> no vreg spills for larger N / HW.
    s, ss = jax.lax.fori_loop(0, n, stats_body, (zeros, zeros),
                              unroll=(n <= 4))
    mean = s / count
    var = jnp.maximum(ss / count - mean * mean, 0.0)        # biased variance
    scale = gamma_ref[...] * jax.lax.rsqrt(var + eps)       # (C, 1)
    shift = beta_ref[...] - mean * scale                    # (C, 1)

    def norm_body(i, carry):
        xf = x_ref[i].astype(jnp.float32)
        y = xf * scale + shift
        # LeakyReLU(0.2): max(y, 0.2*y) (1 VALU op vs cmp+select).
        o_ref[i] = jnp.maximum(y, slope * y).astype(o_ref.dtype)
        return carry

    jax.lax.fori_loop(0, n, norm_body, 0, unroll=(n <= 4))


def _stats_kernel(x_ref, sum_ref, sq_ref, *, hw_total, hw_blk, ragged):
    """Pass 1: per-grid-N partial sum / sum-of-squares over the HW axis."""
    # Init per-ni at the first HW step so the N axis can stay "parallel".
    @pl.when(pl.program_id(1) == 0)
    def _():
        sum_ref[...] = jnp.zeros_like(sum_ref)
        sq_ref[...] = jnp.zeros_like(sq_ref)

    xf = x_ref[...].astype(jnp.float32)                     # (n_blk, C, hw_blk)
    if ragged:
        # Mask the HW overhang of the (padded) last block before reducing.
        lane = jax.lax.broadcasted_iota(jnp.int32, xf.shape, xf.ndim - 1)
        valid = pl.program_id(1) * hw_blk + lane < hw_total
        xf = jnp.where(valid, xf, 0.0)

    sum_ref[...] += jnp.sum(jnp.sum(xf, axis=2, keepdims=True), axis=0)
    sq_ref[...] += jnp.sum(jnp.sum(xf * xf, axis=2, keepdims=True), axis=0)


def _norm_kernel(x_ref, scale_ref, shift_ref, o_ref, *, slope):
    """Pass 2: y = leaky_relu(x * scale + shift) on a lane-dense tile.

    A ragged last HW block needs no masking: Pallas discards stores to the
    padded region, and the garbage read there never reaches HBM.
    """
    xf = x_ref[...].astype(jnp.float32)                     # (n_blk, C, hw_blk)
    y = xf * scale_ref[...] + shift_ref[...]
    o_ref[...] = jnp.maximum(y, slope * y).astype(o_ref.dtype)


# ----------------------------- tile pickers ---------------------------------


def _pick_hw_block(hw, c, itemsize, target_bytes):
    """Lane width: a multiple of 128 (or the full HW row) within target_bytes."""
    max_lanes = max(128, (target_bytes // (itemsize * max(c, 1))) // 128 * 128)
    if hw <= max_lanes:
        return hw                                   # full row, always legal
    # Prefer an exact divisor of HW (no ragged tile) if it is big enough.
    best_div = 0
    if hw % 128 == 0:
        n128 = hw // 128
        d = 1
        while d * d <= n128:
            if n128 % d == 0:
                for cand in (d, n128 // d):
                    lanes = cand * 128
                    if best_div < lanes <= max_lanes:
                        best_div = lanes
            d += 1
    if best_div >= max_lanes // 2:
        return best_div
    return max_lanes                                # ragged last tile (masked)


def _pick_n_block(n, c, hw_blk, itemsize, target_bytes):
    """Also block over N when a single (C, hw_blk) slice is far below budget."""
    per_n = max(1, c * hw_blk * itemsize)
    max_n = max(1, target_bytes // per_n)
    best = 1
    for d in range(1, n + 1):
        if n % d == 0 and d <= max_n:
            best = d
    return best


# ----------------------------- wrapper --------------------------------------


def batchnorm_leakyrelu(x_nchw, gamma, beta, *, allow_single_pass=True,
                        stats_tile_bytes=None, norm_tile_bytes=None):
    """x_nchw: (N, C, H, W); gamma/beta: (C,). Returns NCHW output."""
    N, C, H, W = x_nchw.shape
    HW = H * W
    count = float(N * HW)
    cfg = _tpu_config()
    stats_tile = stats_tile_bytes or cfg["stats_tile"]
    norm_tile = norm_tile_bytes or cfg["norm_tile"]

    # Pure reshape (no HBM transpose): channels -> sublanes, H*W -> lanes.
    x3d = x_nchw.reshape(N, C, HW)
    itemsize = x3d.dtype.itemsize
    gamma_c1 = gamma.reshape(C, 1).astype(jnp.float32)
    beta_c1 = beta.reshape(C, 1).astype(jnp.float32)
    x_bytes = N * C * HW * itemsize

    # ---- fused path: one HBM read + one write (vs 2R+W for two-pass).
    # VMEM estimate: double-buffered in+out blocks + f32 temporaries.
    fused_vmem = 4 * x_bytes + 3 * C * HW * 4
    if (allow_single_pass and x_bytes <= cfg["single_pass_max"]
            and fused_vmem <= cfg["vmem_limit"] - 8 * MB):
        fused = functools.partial(_fused_kernel, eps=EPS, slope=NEG_SLOPE)
        y3d = pl.pallas_call(
            fused,
            out_shape=jax.ShapeDtypeStruct((N, C, HW), x3d.dtype),
            grid=(1,),
            in_specs=[
                pl.BlockSpec((N, C, HW), lambda i: (0, 0, 0)),
                pl.BlockSpec((C, 1), lambda i: (0, 0)),
                pl.BlockSpec((C, 1), lambda i: (0, 0)),
            ],
            out_specs=pl.BlockSpec((N, C, HW), lambda i: (0, 0, 0)),
            compiler_params=pltpu.CompilerParams(
                dimension_semantics=("arbitrary",),
                vmem_limit_bytes=cfg["vmem_limit"]),
        )(x3d, gamma_c1, beta_c1)
        return y3d.reshape(N, C, H, W)

    # ---- streaming two-pass path ----
    # Pass 1 streams only an input (no output tile) -> larger tile budget.
    hw_blk_s = _pick_hw_block(HW, C, itemsize, stats_tile)
    n_blk_s = _pick_n_block(N, C, hw_blk_s, itemsize, stats_tile)
    num_hw_s = -(-HW // hw_blk_s)
    n_grid_s = N // n_blk_s
    ragged_s = (HW % hw_blk_s) != 0

    stats_fn = functools.partial(_stats_kernel, hw_total=HW, hw_blk=hw_blk_s,
                                 ragged=ragged_s)
    stats_in_spec = pl.BlockSpec((n_blk_s, C, hw_blk_s),
                                 lambda ni, hi: (ni, 0, hi))
    if cfg["stats_buffers"] > 2:
        # Deeper pipelining for the read-only stats stream (v7x headroom).
        try:
            stats_in_spec = pl.BlockSpec(
                (n_blk_s, C, hw_blk_s), lambda ni, hi: (ni, 0, hi),
                pipeline_mode=pl.Buffered(cfg["stats_buffers"]))
        except Exception:
            pass  # fall back to default double-buffering

    sum_parts, sq_parts = pl.pallas_call(
        stats_fn,
        out_shape=(jax.ShapeDtypeStruct((n_grid_s, C, 1), jnp.float32),
                   jax.ShapeDtypeStruct((n_grid_s, C, 1), jnp.float32)),
        grid=(n_grid_s, num_hw_s),
        in_specs=[stats_in_spec],
        out_specs=(pl.BlockSpec((None, C, 1), lambda ni, hi: (ni, 0, 0)),
                   pl.BlockSpec((None, C, 1), lambda ni, hi: (ni, 0, 0))),
        compiler_params=pltpu.CompilerParams(
            # Per-N partial accumulators keep the N axis legally parallel, so
            # pass 1 shards across both TensorCores on v7x.
            dimension_semantics=("parallel", "arbitrary"),
            vmem_limit_bytes=cfg["vmem_limit"]),
    )(x3d)

    # Tiny per-channel finalize (C elements) in plain jnp.  Kept outside the
    # stats kernel so its outputs remain per-N partials (v7x 2-core win).
    # TODO(synk): E[x^2]-E[x]^2 in f32 can lose precision for strongly
    # non-zero-mean activations; a shifted/centered accumulation would fix it.
    sum_c = jnp.sum(sum_parts, axis=0)                      # (C, 1)
    sq_c = jnp.sum(sq_parts, axis=0)                        # (C, 1)
    mean = sum_c / count
    var = jnp.maximum(sq_c / count - mean * mean, 0.0)      # biased variance
    scale = gamma_c1 * jax.lax.rsqrt(var + EPS)             # (C, 1)
    shift = beta_c1 - mean * scale                          # (C, 1)

    # Pass 2: normalize + affine + LeakyReLU, fully parallel over tiles.
    hw_blk_n = _pick_hw_block(HW, C, itemsize, norm_tile)
    n_blk_n = _pick_n_block(N, C, hw_blk_n, itemsize, norm_tile)
    num_hw_n = -(-HW // hw_blk_n)
    n_grid_n = N // n_blk_n

    norm_fn = functools.partial(_norm_kernel, slope=NEG_SLOPE)
    y3d = pl.pallas_call(
        norm_fn,
        out_shape=jax.ShapeDtypeStruct((N, C, HW), x3d.dtype),
        grid=(n_grid_n, num_hw_n),
        in_specs=[
            pl.BlockSpec((n_blk_n, C, hw_blk_n), lambda ni, hi: (ni, 0, hi)),
            pl.BlockSpec((C, 1), lambda ni, hi: (0, 0)),
            pl.BlockSpec((C, 1), lambda ni, hi: (0, 0)),
        ],
        out_specs=pl.BlockSpec((n_blk_n, C, hw_blk_n),
                               lambda ni, hi: (ni, 0, hi)),
        compiler_params=pltpu.CompilerParams(
            dimension_semantics=("parallel", "parallel"),
            vmem_limit_bytes=cfg["vmem_limit"]),
    )(x3d, scale, shift)

    return y3d.reshape(N, C, H, W)


# ----------------------------- reference & test ----------------------------


def _reference(x_nchw, gamma, beta):
    # Pure-JAX reference of BatchNorm2d(training) + LeakyReLU(0.2)
    mean = jnp.mean(x_nchw, axis=(0, 2, 3), keepdims=True)
    var = jnp.mean((x_nchw - mean) ** 2, axis=(0, 2, 3), keepdims=True)
    y = (x_nchw - mean) / jnp.sqrt(var + EPS)
    y = y * gamma.reshape(1, -1, 1, 1) + beta.reshape(1, -1, 1, 1)
    return jnp.where(y >= 0, y, NEG_SLOPE * y)


if __name__ == "__main__":
    key = jax.random.PRNGKey(0)
    kx, kg, kb, kx2 = jax.random.split(key, 4)
    N, C, H, W = 2, 4, 16, 16
    x = jax.random.normal(kx, (N, C, H, W), dtype=jnp.float32)

    # Non-trivial (deterministic) affine parameters to exercise scale/shift.
    gamma = 1.0 + 0.1 * jax.random.normal(kg, (C,), dtype=jnp.float32)
    beta = 0.1 * jax.random.normal(kb, (C,), dtype=jnp.float32)

    ref = _reference(x, gamma, beta)

    # 1) Fused single-pass path (what this small case dispatches to).
    out_fused = jax.block_until_ready(batchnorm_leakyrelu(x, gamma, beta))
    assert out_fused.shape == (N, C, H, W)
    assert jnp.allclose(out_fused, ref, atol=1e-4, rtol=1e-4)

    # 2) Two-pass streaming path (what large activations dispatch to).
    out_stream = jax.block_until_ready(
        batchnorm_leakyrelu(x, gamma, beta, allow_single_pass=False))
    assert out_stream.shape == (N, C, H, W)
    assert jnp.allclose(out_stream, ref, atol=1e-4, rtol=1e-4)

    # 3) Streaming path with H*W not a multiple of the tile (ragged last HW
    #    block -> masked reduction + partial-store), forced via tiny tiles.
    H2, W2 = 16, 20                                   # HW = 320 = 2*128 + 64
    x2 = jax.random.normal(kx2, (N, C, H2, W2), dtype=jnp.float32)
    ref2 = _reference(x2, gamma, beta)
    out_ragged = jax.block_until_ready(
        batchnorm_leakyrelu(x2, gamma, beta, allow_single_pass=False,
                            stats_tile_bytes=2048, norm_tile_bytes=2048))
    assert out_ragged.shape == (N, C, H2, W2)
    assert jnp.allclose(out_ragged, ref2, atol=1e-4, rtol=1e-4)

    print("KERNEL_OK")
</pallas_src>

<mosaic_0001>
module attributes {stable_mosaic.version = 11 : i64} {
  func.func @_fused_kernel(%arg0: i32, %arg1: memref<2x4x256xf32, #tpu.memory_space<vmem>>, %arg2: memref<4x1xf32, #tpu.memory_space<vmem>>, %arg3: memref<4x1xf32, #tpu.memory_space<vmem>>, %arg4: memref<2x4x256xf32, #tpu.memory_space<vmem>>) attributes {dimension_semantics = [#tpu.dimension_semantics<arbitrary>], iteration_bounds = array<i64: 1>, scalar_prefetch = 0 : i64, scratch_operands = 0 : i64, tpu.core_type = #tpu.core_type<tc>, window_params = [{pipeline_mode = #tpu.pipeline_mode<synchronous>, transform_indices = @transform_0, window_bounds = array<i64: 2, 4, 256>}, {pipeline_mode = #tpu.pipeline_mode<synchronous>, transform_indices = @transform_1, window_bounds = array<i64: 4, 1>}, {pipeline_mode = #tpu.pipeline_mode<synchronous>, transform_indices = @transform_2, window_bounds = array<i64: 4, 1>}, {pipeline_mode = #tpu.pipeline_mode<synchronous>, transform_indices = @transform_3, window_bounds = array<i64: 2, 4, 256>}]} {
    %cst = arith.constant 0.000000e+00 : f32
    %0 = vector.broadcast %cst : f32 to vector<4x1xf32>
    %c0_i32 = arith.constant 0 : i32
    %1 = arith.index_cast %c0_i32 : i32 to index
    %c0 = arith.constant 0 : index
    %c0_0 = arith.constant 0 : index
    %2 = vector.load %arg1[%1, %c0, %c0_0] : memref<2x4x256xf32, #tpu.memory_space<vmem>>, vector<1x4x256xf32>
    %3 = vector.shape_cast %2 : vector<1x4x256xf32> to vector<4x256xf32>
    %cst_1 = arith.constant dense<0.000000e+00> : vector<4xf32>
    %4 = vector.multi_reduction <add>, %3, %cst_1 [1] : vector<4x256xf32> to vector<4xf32>
    %5 = vector.shape_cast %4 : vector<4xf32> to vector<4x1xf32>
    %6 = arith.addf %0, %5 : vector<4x1xf32>
    %7 = arith.mulf %3, %3 : vector<4x256xf32>
    %cst_2 = arith.constant dense<0.000000e+00> : vector<4xf32>
    %8 = vector.multi_reduction <add>, %7, %cst_2 [1] : vector<4x256xf32> to vector<4xf32>
    %9 = vector.shape_cast %8 : vector<4xf32> to vector<4x1xf32>
    %10 = arith.addf %0, %9 : vector<4x1xf32>
    %c1_i32 = arith.constant 1 : i32
    %11 = arith.index_cast %c1_i32 : i32 to index
    %c0_3 = arith.constant 0 : index
    %c0_4 = arith.constant 0 : index
    %12 = vector.load %arg1[%11, %c0_3, %c0_4] : memref<2x4x256xf32, #tpu.memory_space<vmem>>, vector<1x4x256xf32>
    %13 = vector.shape_cast %12 : vector<1x4x256xf32> to vector<4x256xf32>
    %cst_5 = arith.constant dense<0.000000e+00> : vector<4xf32>
    %14 = vector.multi_reduction <add>, %13, %cst_5 [1] : vector<4x256xf32> to vector<4xf32>
    %15 = vector.shape_cast %14 : vector<4xf32> to vector<4x1xf32>
    %16 = arith.addf %6, %15 : vector<4x1xf32>
    %17 = arith.mulf %13, %13 : vector<4x256xf32>
    %cst_6 = arith.constant dense<0.000000e+00> : vector<4xf32>
    %18 = vector.multi_reduction <add>, %17, %cst_6 [1] : vector<4x256xf32> to vector<4xf32>
    %19 = vector.shape_cast %18 : vector<4xf32> to vector<4x1xf32>
    %20 = arith.addf %10, %19 : vector<4x1xf32>
    %c2_i32 = arith.constant 2 : i32
    %cst_7 = arith.constant 5.120000e+02 : f32
    %21 = vector.broadcast %cst_7 : f32 to vector<4x1xf32>
    %22 = arith.divf %16, %21 : vector<4x1xf32>
    %cst_8 = arith.constant 5.120000e+02 : f32
    %23 = vector.broadcast %cst_8 : f32 to vector<4x1xf32>
    %24 = arith.divf %20, %23 : vector<4x1xf32>
    %25 = arith.mulf %22, %22 : vector<4x1xf32>
    %26 = arith.subf %24, %25 : vector<4x1xf32>
    %cst_9 = arith.constant 0.000000e+00 : f32
    %27 = vector.broadcast %cst_9 : f32 to vector<4x1xf32>
    %28 = arith.maximumf %26, %27 : vector<4x1xf32>
    %c0_10 = arith.constant 0 : index
    %c0_11 = arith.constant 0 : index
    %29 = vector.load %arg2[%c0_10, %c0_11] : memref<4x1xf32, #tpu.memory_space<vmem>>, vector<4x1xf32>
    %cst_12 = arith.constant 9.99999974E-6 : f32
    %30 = vector.broadcast %cst_12 : f32 to vector<4x1xf32>
    %31 = arith.addf %28, %30 : vector<4x1xf32>
    %32 = math.rsqrt %31 : vector<4x1xf32>
    %33 = arith.mulf %29, %32 : vector<4x1xf32>
    %c0_13 = arith.constant 0 : index
    %c0_14 = arith.constant 0 : index
    %34 = vector.load %arg3[%c0_13, %c0_14] : memref<4x1xf32, #tpu.memory_space<vmem>>, vector<4x1xf32>
    %35 = arith.mulf %22, %33 : vector<4x1xf32>
    %36 = arith.subf %34, %35 : vector<4x1xf32>
    %c0_i32_15 = arith.constant 0 : i32
    %37 = arith.index_cast %c0_i32_15 : i32 to index
    %c0_16 = arith.constant 0 : index
    %c0_17 = arith.constant 0 : index
    %38 = vector.load %arg1[%37, %c0_16, %c0_17] : memref<2x4x256xf32, #tpu.memory_space<vmem>>, vector<1x4x256xf32>
    %39 = vector.shape_cast %38 : vector<1x4x256xf32> to vector<4x256xf32>
    %40 = vector.broadcast %33 : vector<4x1xf32> to vector<4x256xf32>
    %41 = arith.mulf %39, %40 : vector<4x256xf32>
    %42 = vector.broadcast %36 : vector<4x1xf32> to vector<4x256xf32>
    %43 = arith.addf %41, %42 : vector<4x256xf32>
    %cst_18 = arith.constant 2.000000e-01 : f32
    %44 = vector.broadcast %cst_18 : f32 to vector<4x256xf32>
    %45 = arith.mulf %44, %43 : vector<4x256xf32>
    %46 = arith.maximumf %43, %45 : vector<4x256xf32>
    %47 = arith.index_cast %c0_i32_15 : i32 to index
    %c0_19 = arith.constant 0 : index
    %c0_20 = arith.constant 0 : index
    %48 = vector.load %arg4[%47, %c0_19, %c0_20] : memref<2x4x256xf32, #tpu.memory_space<vmem>>, vector<1x4x256xf32>
    %49 = vector.shape_cast %48 : vector<1x4x256xf32> to vector<4x256xf32>
    %50 = vector.shape_cast %46 : vector<4x256xf32> to vector<1x4x256xf32>
    tpu.vector_store %arg4[%47, %c0_19, %c0_20], %50 {strides = array<i32>} : memref<2x4x256xf32, #tpu.memory_space<vmem>>, vector<1x4x256xf32>,
    %c1_i32_21 = arith.constant 1 : i32
    %51 = arith.index_cast %c1_i32_21 : i32 to index
    %c0_22 = arith.constant 0 : index
    %c0_23 = arith.constant 0 : index
    %52 = vector.load %arg1[%51, %c0_22, %c0_23] : memref<2x4x256xf32, #tpu.memory_space<vmem>>, vector<1x4x256xf32>
    %53 = vector.shape_cast %52 : vector<1x4x256xf32> to vector<4x256xf32>
    %54 = vector.broadcast %33 : vector<4x1xf32> to vector<4x256xf32>
    %55 = arith.mulf %53, %54 : vector<4x256xf32>
    %56 = vector.broadcast %36 : vector<4x1xf32> to vector<4x256xf32>
    %57 = arith.addf %55, %56 : vector<4x256xf32>
    %cst_24 = arith.constant 2.000000e-01 : f32
    %58 = vector.broadcast %cst_24 : f32 to vector<4x256xf32>
    %59 = arith.mulf %58, %57 : vector<4x256xf32>
    %60 = arith.maximumf %57, %59 : vector<4x256xf32>
    %61 = arith.index_cast %c1_i32_21 : i32 to index
    %c0_25 = arith.constant 0 : index
    %c0_26 = arith.constant 0 : index
    %62 = vector.load %arg4[%61, %c0_25, %c0_26] : memref<2x4x256xf32, #tpu.memory_space<vmem>>, vector<1x4x256xf32>
    %63 = vector.shape_cast %62 : vector<1x4x256xf32> to vector<4x256xf32>
    %64 = vector.shape_cast %60 : vector<4x256xf32> to vector<1x4x256xf32>
    tpu.vector_store %arg4[%61, %c0_25, %c0_26], %64 {strides = array<i32>} : memref<2x4x256xf32, #tpu.memory_space<vmem>>, vector<1x4x256xf32>,
    %c2_i32_27 = arith.constant 2 : i32
    return
  }
  func.func @transform_0(%arg0: i32) -> (i32, i32, i32) {
    %c0_i32 = arith.constant 0 : i32
    %c0_i32_0 = arith.constant 0 : i32
    %c0_i32_1 = arith.constant 0 : i32
    %c0_i32_2 = arith.constant 0 : i32
    return %c0_i32, %c0_i32_0, %c0_i32_1 : i32, i32, i32
  }
  func.func @transform_1(%arg0: i32) -> (i32, i32) {
    %c0_i32 = arith.constant 0 : i32
    %c0_i32_0 = arith.constant 0 : i32
    %c0_i32_1 = arith.constant 0 : i32
    return %c0_i32, %c0_i32_0 : i32, i32
  }
  func.func @transform_2(%arg0: i32) -> (i32, i32) {
    %c0_i32 = arith.constant 0 : i32
    %c0_i32_0 = arith.constant 0 : i32
    %c0_i32_1 = arith.constant 0 : i32
    return %c0_i32, %c0_i32_0 : i32, i32
  }
  func.func @transform_3(%arg0: i32) -> (i32, i32, i32) {
    %c0_i32 = arith.constant 0 : i32
    %c0_i32_0 = arith.constant 0 : i32
    %c0_i32_1 = arith.constant 0 : i32
    %c0_i32_2 = arith.constant 0 : i32
    return %c0_i32, %c0_i32_0, %c0_i32_1 : i32, i32, i32
  }
}

</mosaic_0001>

<bundles_post_ra>
// kernel: tpu_custom_call.1
= control target key start
LH: loop header
LB: loop body
LE: loop exit
PB: predicated region body
PF: predicated region fallthrough
CT: control target
= control target key end

     0   :  { %8 = vsyncpa [#allocation3], 0  ;;  %s292_s0 = inlined_call_operand.hbm [shape: f32[2,4,256], index: 0, kind: input, shape index: {}]   ;;  %s293_s1 = inlined_call_operand.vmem [shape: f32[4,1], index: 1, kind: input, shape index: {}]   ;;  %s294_s2 = inlined_call_operand.vmem [shape: f32[4,1], index: 2, kind: input, shape index: {}]   ;;  %s295_s3 = inlined_call_operand.hbm [shape: f32[2,4,256], index: 3, kind: output, shape index: {}]  }
   0x1   :  { %9 = vsyncpa [#allocation4], 0  ;;  %s14_s14 = sshll.u32 %s292_s0, 4  ;;  %s227_s15 = smov [#allocation2]   ;;  %s15_s14 = int_to_ptr.hbm [resolvable:$true] %s14_s14 }
   0x2   :  { %s16_s16 = sshll.u32 %s227_s15, 4  ;;  %s228_s17 = smov 128   ;;  %s17_s16 = int_to_ptr.vmem [resolvable:$true] %s16_s16 }
   0x3   :  { %s229_s18 = smov 8  }
   0x4   :  { %22 = dma.hbm_to_vmem [thread:$0]  %s15_s14, 256, %s17_s16, [#allocation3], %s228_s17, %s228_s17, %s229_s18  }
   0x5   :  { %223 = dma.done.wait [#allocation3], 256  }
   0x6   :  { %224 = vsyncadd [#allocation3], 4294967040  ;;  %v260_v0 = vld [vmem:[#allocation2] sm:$0xff]  ;;  %vm38_vm0 = vcmask 1043456   ;;  %v267_v7 = vld [vmem:[#allocation2 + $0x8] sm:$0xff]  ;;  %v230_v24 = vmov 512.0  }
   0x7   :  { %33 = vst [vmem:[#allocation1] ss:$2 sm:$0xff] %v260_v0  ;;  %v45_v1 = vmul.f32 %v260_v0, %v260_v0  ;;  %v72_v13 = vmul.f32 %v267_v7, %v267_v7  ;;  %171 = vrcp.f32 %v230_v24  ;;  %v231_v29 = vmov 0   ;;  %v97_v49 = vld [vmem:[%s293_s1] sm:$0xf]  ;;  %s233_s1 = smov [#allocation5]  }
   0x8   :  { %169 = vset.pattern.permute.xlu2 %v231_v29  ;;  %170 = vset.pattern.permute.xlu0 %v231_v29  ;;  %v110_v54 = vld [vmem:[%s294_s2] sm:$0xf]  ;;  %v232_v56 = vmov 839922192   ;;  %s147_s22 = sshll.u32 %s233_s1, 4  ;;  %s149_s24 = sshll.u32 %s295_s3, 4  ;;  %s148_s22 = int_to_ptr.vmem [resolvable:$true] %s147_s22  ;;  %s150_s24 = int_to_ptr.hbm [resolvable:$true] %s149_s24 }
   0x9   :  { %v118_v57 = vunpack.c.l.s4 %v232_v56 }
   0xb   :  { %v119_v59 = vunpack.c.0.s8 %v118_v57 }
   0xd   :  { %v172_v25 = vpop.eup %171 }
   0xe   :  { %v34_v2 = vld.sshfl [vmem:[#allocation1] sm:$0xff pattern:$0x75316420]  ;;  %v35_v3 = vld.sshfl [vmem:[#allocation1 + $0x8] sm:$0xff pattern:$0x75316420]  ;;  %vm90_vm1 = vweird.f32 %v172_v25 }
   0xf   :  { %v39_v4 = vsel %vm38_vm0, %v34_v2, 0.0  ;;  %v40_v5 = vsel %vm38_vm0, %v35_v3, 0.0  ;;  %47 = vst [vmem:[#allocation1] ss:$2 sm:$0xff] %v45_v1  ;;  %v86_v26 = vmul.f32 512.0, %v172_v25 }
  0x10   :  { %v41_v6 = vadd.f32 %v40_v5, %v39_v4 }
  0x11   :  { %v87_v28 = vsub.f32 1.0, %v86_v26 }
  0x12   :  { %42 = vadd.xlane.f32.xlu0 %v41_v6 }
  0x13   :  { %v88_v30 = vmul.f32 %v172_v25, %v87_v28 }
  0x15   :  { %v89_v32 = vadd.f32 %v172_v25, %v88_v30 }
  0x16   :  { %v48_v8 = vld.sshfl [vmem:[#allocation1] sm:$0xff pattern:$0x75316420]  ;;  %v49_v9 = vld.sshfl [vmem:[#allocation1 + $0x8] sm:$0xff pattern:$0x75316420] }
  0x17   :  { %v52_v10 = vsel %vm38_vm0, %v48_v8, 0.0  ;;  %v53_v11 = vsel %vm38_vm0, %v49_v9, 0.0  ;;  %61 = vst [vmem:[#allocation1] ss:$2 sm:$0xff] %v267_v7  ;;  %v91_v35 = vsel %vm90_vm1, %v172_v25, %v89_v32 }
  0x18   :  { %v54_v12 = vadd.f32 %v53_v11, %v52_v10 }
  0x1a   :  { %55 = vadd.xlane.f32.xlu1 %v54_v12 }
  0x1e   :  { %v62_v14 = vld.sshfl [vmem:[#allocation1] sm:$0xff pattern:$0x75316420]  ;;  %v63_v15 = vld.sshfl [vmem:[#allocation1 + $0x8] sm:$0xff pattern:$0x75316420] }
  0x1f   :  { %v66_v16 = vsel %vm38_vm0, %v62_v14, 0.0  ;;  %v67_v17 = vsel %vm38_vm0, %v63_v15, 0.0  ;;  %74 = vst [vmem:[#allocation1] ss:$2 sm:$0xff] %v72_v13 }
  0x20   :  { %v68_v18 = vadd.f32 %v67_v17, %v66_v16 }
  0x22   :  { %69 = vadd.xlane.f32.xlu0 %v68_v18 }
  0x26   :  { %v75_v19 = vld.sshfl [vmem:[#allocation1] sm:$0xff pattern:$0x75316420]  ;;  %v76_v20 = vld.sshfl [vmem:[#allocation1 + $0x8] sm:$0xff pattern:$0x75316420] }
  0x27   :  { %v79_v21 = vsel %vm38_vm0, %v75_v19, 0.0  ;;  %v80_v22 = vsel %vm38_vm0, %v76_v20, 0.0 }
  0x28   :  { %v81_v23 = vadd.f32 %v80_v22, %v79_v21 }
  0x2a   :  { %82 = vadd.xlane.f32.xlu1 %v81_v23 }
  0x85   :  { %v43_v27 = vpop.xlane.xlu0 %42 }
  0x8d   :  { %v56_v31 = vpop.xlane.xlu1 %55 }
  0x95   :  { %v70_v33 = vpop.xlane.xlu0 %69 }
  0x96   :  { %v71_v34 = vadd.f32 %v70_v33, %v43_v27 }
  0x98   :  { %v92_v36 = vmul.f32 %v91_v35, %v71_v34 }
  0x9a   :  { %v94_v39 = vmul.f32 %v92_v36, %v92_v36 }
  0x9d   :  { %v83_v37 = vpop.xlane.xlu1 %82 }
  0x9e   :  { %v84_v38 = vadd.f32 %v83_v37, %v56_v31 }
  0xa0   :  { %v93_v40 = vmul.f32 %v91_v35, %v84_v38 }
  0xa2   :  { %v95_v41 = vsub.f32 %v93_v40, %v94_v39 }
  0xa4   :  { %v96_v42 = vmax.f32 %v95_v41, 0.0 }
  0xa6   :  { %v98_v43 = vadd.f32 1e-05, %v96_v42 }
  0xa8   :  { %173 = vrsqrt.f32 %v98_v43  ;;  %vm105_vm3 = vweird.f32 %v98_v43 }
  0xae   :  { %v174_v44 = vpop.eup %173 }
  0xaf   :  { %v100_v45 = vmul.f32 %v174_v44, %v98_v43  ;;  %vm106_vm2 = vweird.f32 %v174_v44 }
  0xb0   :  { %vm107_vm4 = vmor %vm105_vm3, %vm106_vm2 }
  0xb1   :  { %v101_v46 = vmul.f32 %v174_v44, %v100_v45 }
  0xb3   :  { %v102_v47 = vmul.f32 0.5, %v101_v46 }
  0xb5   :  { %v103_v48 = vsub.f32 1.5, %v102_v47 }
  0xb7   :  { %v104_v50 = vmul.f32 %v174_v44, %v103_v48 }
  0xb9   :  { %v108_v51 = vsel %vm107_vm4, %v174_v44, %v104_v50 }
  0xba   :  { %v109_v52 = vmul.f32 %v108_v51, %v97_v49 }
  0xbc   :  { %115 = vperm.xlu2 %169, %v109_v52   ;;  %v111_v53 = vmul.f32 %v109_v52, %v92_v36 }
  0xbe   :  { %v112_v55 = vsub.f32 %v110_v54, %v111_v53 }
  0xc4   :  { %125 = vperm.xlu2 %169, %v112_v55  }
 0x116   :  { %v116_v58 = vpop.permute.xlu2 %115 }
 0x117   :  { %v120_v60 = vperm.slane %v116_v58, %v119_v59 }
 0x119   :  { %v122_v62 = vmul.f32 %v120_v60, %v260_v0  ;;  %v137_v63 = vmul.f32 %v120_v60, %v267_v7 }
 0x11e   :  { %v126_v61 = vpop.permute.xlu2 %125 }
 0x11f   :  { %v130_v1 = vperm.slane %v126_v61, %v119_v59 }
 0x121   :  { %v132_v2 = vadd.f32 %v130_v1, %v122_v62  ;;  %v138_v3 = vadd.f32 %v137_v63, %v130_v1 }
 0x123   :  { %v133_v4 = vmul.f32 0.2, %v132_v2  ;;  %v139_v5 = vmul.f32 0.2, %v138_v3 }
 0x125   :  { %v134_v6 = vmax.f32 %v132_v2, %v133_v4  ;;  %v140_v8 = vmax.f32 %v138_v3, %v139_v5 }
 0x127   :  { %135 = vst [vmem:[#allocation5] sm:$0xff] %v134_v6 }
 0x128   :  { %142 = vst [vmem:[#allocation5 + $0x8] sm:$0xff] %v140_v8 }
 0x129   :  { %155 = dma.vmem_to_hbm [thread:$0]  %s148_s22, 256, %s150_s24, [#allocation4], %s228_s17, %s228_s17, %s229_s18  }
 0x12a   :  { %225 = dma.done.wait [#allocation4], 256  }
 0x12b   :  { %226 = vsyncadd [#allocation4], 4294967040 }
 0x12c   :  { %160 = vsyncpa [#allocation3], 1 }
 0x12d   :  { %161 = vsyncpa [#allocation4], 1 }

</bundles_post_ra>
